<compile_context>
chip_gen: v5e
topology: v5e:2x2
jax: 0.10.0
libtpu: 0.0.40
codegen_flags: <defaults>
</compile_context>

<pallas_src>
import numpy as np
import jax
import jax.numpy as jnp
from jax.experimental import pallas as pl
from jax.experimental.pallas import tpu as pltpu

BN_EPS = 1e-5
TP_MAX = 32768                    # max lanes per grid step (sweepable 8192-65536)
STEP_PAYLOAD_TARGET = 2 << 20     # target ~2 MiB of HBM traffic per grid step
VMEM_TILE_BUDGET = 12 << 20       # double-buffered blocks + f32 intermediates per step
VMEM_LIMIT_BYTES = 32 << 20       # explicit scoped-VMEM limit (v5e default is 16 MiB)


# ----------------------------- Pallas kernels ------------------------------ #

def _fused_kernel(gate_ref, skip_ref, wg_ref, ws_ref, bsum_ref, wpsi_ref, bpsi_ref, o_ref):
    """out = skip * sigmoid(Wpsi' . relu(Wg'@gate + Ws'@skip + b_sum) + bpsi')."""
    wg = wg_ref[...]                      # (Ci, Cg)
    ws = ws_ref[...]                      # (Ci, Cs)
    bsum = bsum_ref[...]                  # (Ci, 1)
    wpsi = wpsi_ref[...]                  # (Ci, 1)
    bpsi = bpsi_ref[0]                    # scalar (SMEM)
    for b in range(gate_ref.shape[0]):    # static batch-block loop (unrolled, BN is tiny)
        g = gate_ref[b]                                                       # (Cg, tp)
        s = skip_ref[b]                                                       # (Cs, tp)
        z = jnp.dot(wg, g, preferred_element_type=jnp.float32)                # (Ci, tp)
        z = z + jnp.dot(ws, s, preferred_element_type=jnp.float32)
        a = jnp.maximum(z + bsum, 0.0)                                        # ReLU
        # psi projection: VPU broadcast-mul + sublane reduce (no 1-column MXU matmul)
        psi = jax.nn.sigmoid(jnp.sum(a * wpsi, axis=0, keepdims=True) + bpsi)  # (1, tp)
        o_ref[b] = (s.astype(jnp.float32) * psi).astype(o_ref.dtype)


def _gate_proj_kernel(gate_ref, wg_ref, bg_ref, o_ref):
    """g1 = Wg'@gate + bg' (conv1x1 with BN folded), for the Cg > Ci resize-fallback path."""
    wg = wg_ref[...]
    bg = bg_ref[...]
    for b in range(gate_ref.shape[0]):
        y = jnp.dot(wg, gate_ref[b], preferred_element_type=jnp.float32) + bg
        o_ref[b] = y.astype(o_ref.dtype)


def _skip_fuse_kernel(g1_ref, skip_ref, ws_ref, bs_ref, wpsi_ref, bpsi_ref, o_ref):
    """out = skip * sigmoid(Wpsi' . relu(g1 + Ws'@skip + bs') + bpsi')."""
    ws = ws_ref[...]
    bs = bs_ref[...]
    wpsi = wpsi_ref[...]
    bpsi = bpsi_ref[0]
    for b in range(skip_ref.shape[0]):
        s = skip_ref[b]                                                       # (Cs, tp)
        g1 = g1_ref[b].astype(jnp.float32)                                    # (Ci, tp)
        a = jnp.maximum(g1 + jnp.dot(ws, s, preferred_element_type=jnp.float32) + bs, 0.0)
        psi = jax.nn.sigmoid(jnp.sum(a * wpsi, axis=0, keepdims=True) + bpsi)
        o_ref[b] = (s.astype(jnp.float32) * psi).astype(o_ref.dtype)


# ------------------------------- tiling / params ---------------------------- #

def _round_down_128(x):
    return max(128, (x // 128) * 128)


def _pick_tiling(N, P, io_px, live_px):
    """Choose (batch_block, pixel_tile).  io_px/live_px = bytes per pixel per image."""
    def tp_cap(bn):
        return _round_down_128(min(VMEM_TILE_BUDGET // max(bn * live_px, 1), TP_MAX))

    # Fold the batch into the block when one image's pixels can't fill a target-sized step
    # (amortizes the ~0.35us per-step overhead without any HBM transpose).
    fold = (N > 1 and P * io_px < STEP_PAYLOAD_TARGET
            and N * min(P, TP_MAX) * live_px <= VMEM_TILE_BUDGET)
    bn = N if fold else 1

    tp = min(P, tp_cap(bn))
    if tp < P:
        tp = _round_down_128(tp)   # ragged last tile handled by Pallas boundary masking
    return bn, tp


def _compiler_params():
    return pltpu.CompilerParams(
        dimension_semantics=("parallel", "parallel"),
        vmem_limit_bytes=VMEM_LIMIT_BYTES)


def _fold_conv_bn(w4, b, gamma, beta, mean, var):
    """Fold conv bias + inference BatchNorm into the 1x1 conv weights."""
    w = w4[:, :, 0, 0].astype(jnp.float32)                 # (Cout, Cin)
    scale = gamma.astype(jnp.float32) / jnp.sqrt(var.astype(jnp.float32) + BN_EPS)
    shift = beta.astype(jnp.float32) - mean.astype(jnp.float32) * scale
    return w * scale[:, None], (b.astype(jnp.float32) * scale + shift)


def _fold_params(params):
    wg, bg = _fold_conv_bn(params["w_gate"], params["b_gate"], params["g_gamma"],
                           params["g_beta"], params["g_mean"], params["g_var"])
    ws, bs = _fold_conv_bn(params["w_skip"], params["b_skip"], params["s_gamma"],
                           params["s_beta"], params["s_mean"], params["s_var"])
    wp, bp = _fold_conv_bn(params["w_psi"], params["b_psi"], params["p_gamma"],
                           params["p_beta"], params["p_mean"], params["p_var"])
    Ci = wg.shape[0]
    return dict(
        wg=wg,                                   # (Ci, Cg)
        ws=ws,                                   # (Ci, Cs)
        bg=bg.reshape(Ci, 1),                    # (Ci, 1)
        bs=bs.reshape(Ci, 1),                    # (Ci, 1)
        wpsi=wp[0].reshape(Ci, 1),               # (Ci, 1)  psi weights * psi BN scale
        bpsi=bp.reshape(1).astype(jnp.float32),  # (1,)     folded psi bias+BN shift (SMEM)
    )


# ------------------------------- pallas_call runners ------------------------ #

def _run_fused(gate, skip, wg, ws, bsum, wpsi, bpsi, out_dtype):
    N, Cg, P = gate.shape
    _, Cs, _ = skip.shape
    Ci = wg.shape[0]
    in_b = max(gate.dtype.itemsize, skip.dtype.itemsize)
    out_b = jnp.dtype(out_dtype).itemsize
    io_px = (Cg + Cs) * in_b + Cs * out_b
    live_px = 2 * io_px + 2 * Ci * 4
    bn, tp = _pick_tiling(N, P, io_px, live_px)
    return pl.pallas_call(
        _fused_kernel,
        out_shape=jax.ShapeDtypeStruct((N, Cs, P), out_dtype),
        grid=(N // bn, pl.cdiv(P, tp)),
        in_specs=[
            pl.BlockSpec((bn, Cg, tp), lambda n, p: (n, 0, p)),        # gate pixels
            pl.BlockSpec((bn, Cs, tp), lambda n, p: (n, 0, p)),        # skip pixels
            pl.BlockSpec((Ci, Cg), lambda n, p: (0, 0)),               # folded W_gate
            pl.BlockSpec((Ci, Cs), lambda n, p: (0, 0)),               # folded W_skip
            pl.BlockSpec((Ci, 1), lambda n, p: (0, 0)),                # folded bias sum
            pl.BlockSpec((Ci, 1), lambda n, p: (0, 0)),                # folded W_psi
            pl.BlockSpec(memory_space=pltpu.MemorySpace.SMEM),         # folded psi bias
        ],
        out_specs=pl.BlockSpec((bn, Cs, tp), lambda n, p: (n, 0, p)),
        compiler_params=_compiler_params(),
    )(gate, skip, wg, ws, bsum, wpsi, bpsi)


def _run_gate_proj(gate, wg, bg, g1_dtype):
    N, Cg, P = gate.shape
    Ci = wg.shape[0]
    io_px = Cg * gate.dtype.itemsize + Ci * jnp.dtype(g1_dtype).itemsize
    live_px = 2 * io_px + Ci * 4
    bn, tp = _pick_tiling(N, P, io_px, live_px)
    return pl.pallas_call(
        _gate_proj_kernel,
        out_shape=jax.ShapeDtypeStruct((N, Ci, P), g1_dtype),
        grid=(N // bn, pl.cdiv(P, tp)),
        in_specs=[
            pl.BlockSpec((bn, Cg, tp), lambda n, p: (n, 0, p)),
            pl.BlockSpec((Ci, Cg), lambda n, p: (0, 0)),
            pl.BlockSpec((Ci, 1), lambda n, p: (0, 0)),
        ],
        out_specs=pl.BlockSpec((bn, Ci, tp), lambda n, p: (n, 0, p)),
        compiler_params=_compiler_params(),
    )(gate, wg, bg)


def _run_skip_fuse(g1, skip, ws, bs, wpsi, bpsi, out_dtype):
    N, Ci, P = g1.shape
    _, Cs, _ = skip.shape
    out_b = jnp.dtype(out_dtype).itemsize
    io_px = Ci * g1.dtype.itemsize + Cs * skip.dtype.itemsize + Cs * out_b
    live_px = 2 * io_px + 2 * Ci * 4
    bn, tp = _pick_tiling(N, P, io_px, live_px)
    return pl.pallas_call(
        _skip_fuse_kernel,
        out_shape=jax.ShapeDtypeStruct((N, Cs, P), out_dtype),
        grid=(N // bn, pl.cdiv(P, tp)),
        in_specs=[
            pl.BlockSpec((bn, Ci, tp), lambda n, p: (n, 0, p)),        # resized g1
            pl.BlockSpec((bn, Cs, tp), lambda n, p: (n, 0, p)),        # skip pixels
            pl.BlockSpec((Ci, Cs), lambda n, p: (0, 0)),               # folded W_skip
            pl.BlockSpec((Ci, 1), lambda n, p: (0, 0)),                # folded skip bias
            pl.BlockSpec((Ci, 1), lambda n, p: (0, 0)),                # folded W_psi
            pl.BlockSpec(memory_space=pltpu.MemorySpace.SMEM),         # folded psi bias
        ],
        out_specs=pl.BlockSpec((bn, Cs, tp), lambda n, p: (n, 0, p)),
        compiler_params=_compiler_params(),
    )(g1, skip, ws, bs, wpsi, bpsi)


# ------------------------------------ wrapper -------------------------------- #

def attention_gate_pallas(gate_nchw, skip_nchw, params):
    N, Cg, Hg, Wg = gate_nchw.shape
    Ns, Cs, Hs, Ws = skip_nchw.shape
    assert N == Ns, "gate/skip batch size mismatch"
    fp = _fold_params(params)
    Ci = fp["wg"].shape[0]

    Ps = Hs * Ws
    skip = skip_nchw.reshape(N, Cs, Ps)        # free reshape; no host dtype cast / pad
    out_dtype = skip_nchw.dtype
    same_spatial = (Hg, Wg) == (Hs, Ws)

    if same_spatial or Cg <= Ci:
        if not same_spatial:
            # Bilinear resize commutes with the affine folded conv+BN (weights sum to 1),
            # so resize the RAW gate (Cg channels) instead of the Ci-channel projection:
            # removes one kernel launch and the (N, Ci, P) f32 HBM round-trip.
            # TODO(synk): jax.image.resize(antialias=False) is assumed to match
            # F.interpolate(bilinear, align_corners=False) exactly (half-pixel centers).
            gate_nchw = jax.image.resize(gate_nchw, (N, Cg, Hs, Ws),
                                         method="bilinear", antialias=False)
        gate = gate_nchw.reshape(N, Cg, Ps)
        bsum = fp["bg"] + fp["bs"]
        out = _run_fused(gate, skip, fp["wg"], fp["ws"], bsum, fp["wpsi"], fp["bpsi"],
                         out_dtype)
    else:
        # Cg > Ci: cheaper to project first (fewer channels to resize/move), then resize.
        Pg = Hg * Wg
        gate = gate_nchw.reshape(N, Cg, Pg)
        g1 = _run_gate_proj(gate, fp["wg"], fp["bg"], gate_nchw.dtype)
        g1 = jax.image.resize(g1.reshape(N, Ci, Hg, Wg), (N, Ci, Hs, Ws),
                              method="bilinear", antialias=False)
        out = _run_skip_fuse(g1.reshape(N, Ci, Ps), skip, fp["ws"], fp["bs"],
                             fp["wpsi"], fp["bpsi"], out_dtype)

    return out.reshape(N, Cs, Hs, Ws)          # free reshape back to NCHW


# ----------------------------- pure-JAX reference --------------------------- #

def attention_gate_reference(gate, skip, p):
    def conv1x1(x, w, b):
        return jnp.einsum("nchw,oc->nohw", x, w[:, :, 0, 0]) + b[None, :, None, None]

    def bn(x, gamma, beta, mean, var):
        s = gamma / jnp.sqrt(var + BN_EPS)
        sh = beta - mean * s
        return x * s[None, :, None, None] + sh[None, :, None, None]

    g1 = bn(conv1x1(gate, p["w_gate"], p["b_gate"]), p["g_gamma"], p["g_beta"],
            p["g_mean"], p["g_var"])
    s1 = bn(conv1x1(skip, p["w_skip"], p["b_skip"]), p["s_gamma"], p["s_beta"],
            p["s_mean"], p["s_var"])
    if g1.shape[2:] != s1.shape[2:]:
        g1 = jax.image.resize(g1, (g1.shape[0], g1.shape[1], s1.shape[2], s1.shape[3]),
                              method="bilinear", antialias=False)
    psi = jnp.maximum(g1 + s1, 0.0)
    psi = bn(conv1x1(psi, p["w_psi"], p["b_psi"]), p["p_gamma"], p["p_beta"],
             p["p_mean"], p["p_var"])
    psi = jax.nn.sigmoid(psi)
    return skip * psi


# ------------------------------------ main ---------------------------------- #

if __name__ == "__main__":
    key = jax.random.PRNGKey(0)
    N, H, W = 2, 16, 16
    gate_channels, skip_channels, inter_channels = 8, 4, 16

    ks = jax.random.split(key, 16)
    gate = jax.random.normal(ks[0], (N, gate_channels, H, W), jnp.float32)
    skip = jax.random.normal(ks[1], (N, skip_channels, H, W), jnp.float32)

    params = {
        # W_gate: Conv2d(gate_channels, inter, 1) + BatchNorm2d(inter)
        "w_gate": 0.1 * jax.random.normal(ks[2], (inter_channels, gate_channels, 1, 1)),
        "b_gate": 0.1 * jax.random.normal(ks[3], (inter_channels,)),
        "g_gamma": 1.0 + 0.1 * jax.random.normal(ks[4], (inter_channels,)),
        "g_beta": 0.1 * jax.random.normal(ks[5], (inter_channels,)),
        "g_mean": 0.1 * jax.random.normal(ks[6], (inter_channels,)),
        "g_var": jnp.abs(1.0 + 0.1 * jax.random.normal(ks[7], (inter_channels,))),
        # W_skip: Conv2d(skip_channels, inter, 1) + BatchNorm2d(inter)
        "w_skip": 0.1 * jax.random.normal(ks[8], (inter_channels, skip_channels, 1, 1)),
        "b_skip": 0.1 * jax.random.normal(ks[9], (inter_channels,)),
        "s_gamma": 1.0 + 0.1 * jax.random.normal(ks[10], (inter_channels,)),
        "s_beta": 0.1 * jax.random.normal(ks[11], (inter_channels,)),
        "s_mean": 0.1 * jax.random.normal(ks[12], (inter_channels,)),
        "s_var": jnp.abs(1.0 + 0.1 * jax.random.normal(ks[13], (inter_channels,))),
        # psi: Conv2d(inter, 1, 1) + BatchNorm2d(1) + Sigmoid
        "w_psi": 0.1 * jax.random.normal(ks[14], (1, inter_channels, 1, 1)),
        "b_psi": jnp.array([0.05], jnp.float32),
        "p_gamma": jnp.array([1.1], jnp.float32),
        "p_beta": jnp.array([-0.05], jnp.float32),
        "p_mean": jnp.array([0.02], jnp.float32),
        "p_var": jnp.array([0.9], jnp.float32),
    }

    # Path 1: matching spatial dims -> single fully fused kernel (batch folded into block).
    out = jax.block_until_ready(attention_gate_pallas(gate, skip, params))
    ref = attention_gate_reference(gate, skip, params)
    np.testing.assert_allclose(np.asarray(out), np.asarray(ref), rtol=2e-5, atol=2e-5)

    # Path 2: gate at lower resolution -> resize raw gate (Cg <= Ci), then same fused kernel.
    gate_lo = jax.random.normal(ks[15], (N, gate_channels, H // 2, W // 2), jnp.float32)
    out2 = jax.block_until_ready(attention_gate_pallas(gate_lo, skip, params))
    ref2 = attention_gate_reference(gate_lo, skip, params)
    np.testing.assert_allclose(np.asarray(out2), np.asarray(ref2), rtol=2e-5, atol=2e-5)

    print("KERNEL_OK")
</pallas_src>

<mosaic_0001>
module attributes {stable_mosaic.version = 11 : i64} {
  func.func @_fused_kernel(%arg0: i32, %arg1: i32, %arg2: memref<2x8x256xf32, #tpu.memory_space<vmem>>, %arg3: memref<2x4x256xf32, #tpu.memory_space<vmem>>, %arg4: memref<16x8xf32, #tpu.memory_space<vmem>>, %arg5: memref<16x4xf32, #tpu.memory_space<vmem>>, %arg6: memref<16x1xf32, #tpu.memory_space<vmem>>, %arg7: memref<16x1xf32, #tpu.memory_space<vmem>>, %arg8: memref<1xf32, #tpu.memory_space<smem>>, %arg9: memref<2x4x256xf32, #tpu.memory_space<vmem>>) attributes {dimension_semantics = [#tpu.dimension_semantics<parallel>, #tpu.dimension_semantics<parallel>], iteration_bounds = array<i64: 1, 1>, scalar_prefetch = 0 : i64, scratch_operands = 0 : i64, tpu.core_type = #tpu.core_type<tc>, window_params = [{transform_indices = @transform_0, window_bounds = array<i64: 2, 8, 256>}, {transform_indices = @transform_1, window_bounds = array<i64: 2, 4, 256>}, {pipeline_mode = #tpu.pipeline_mode<synchronous>, transform_indices = @transform_2, window_bounds = array<i64: 16, 8>}, {pipeline_mode = #tpu.pipeline_mode<synchronous>, transform_indices = @transform_3, window_bounds = array<i64: 16, 4>}, {pipeline_mode = #tpu.pipeline_mode<synchronous>, transform_indices = @transform_4, window_bounds = array<i64: 16, 1>}, {pipeline_mode = #tpu.pipeline_mode<synchronous>, transform_indices = @transform_5, window_bounds = array<i64: 16, 1>}, {transform_indices = @transform_6, window_bounds = array<i64: 1>}, {transform_indices = @transform_7, window_bounds = array<i64: 2, 4, 256>}]} {
    %c0 = arith.constant 0 : index
    %c0_0 = arith.constant 0 : index
    %0 = vector.load %arg4[%c0, %c0_0] : memref<16x8xf32, #tpu.memory_space<vmem>>, vector<16x8xf32>
    %c0_1 = arith.constant 0 : index
    %c0_2 = arith.constant 0 : index
    %1 = vector.load %arg5[%c0_1, %c0_2] : memref<16x4xf32, #tpu.memory_space<vmem>>, vector<16x4xf32>
    %c0_3 = arith.constant 0 : index
    %c0_4 = arith.constant 0 : index
    %2 = vector.load %arg6[%c0_3, %c0_4] : memref<16x1xf32, #tpu.memory_space<vmem>>, vector<16x1xf32>
    %c0_5 = arith.constant 0 : index
    %c0_6 = arith.constant 0 : index
    %3 = vector.load %arg7[%c0_5, %c0_6] : memref<16x1xf32, #tpu.memory_space<vmem>>, vector<16x1xf32>
    %c0_7 = arith.constant 0 : index
    %4 = memref.load %arg8[%c0_7] : memref<1xf32, #tpu.memory_space<smem>>
    %c0_8 = arith.constant 0 : index
    %c0_9 = arith.constant 0 : index
    %c0_10 = arith.constant 0 : index
    %5 = vector.load %arg2[%c0_8, %c0_9, %c0_10] : memref<2x8x256xf32, #tpu.memory_space<vmem>>, vector<1x8x256xf32>
    %6 = vector.shape_cast %5 : vector<1x8x256xf32> to vector<8x256xf32>
    %c0_11 = arith.constant 0 : index
    %c0_12 = arith.constant 0 : index
    %c0_13 = arith.constant 0 : index
    %7 = vector.load %arg3[%c0_11, %c0_12, %c0_13] : memref<2x4x256xf32, #tpu.memory_space<vmem>>, vector<1x4x256xf32>
    %8 = vector.shape_cast %7 : vector<1x4x256xf32> to vector<4x256xf32>
    %cst = arith.constant dense<0.000000e+00> : vector<16x256xf32>
    %9 = tpu.matmul %0, %6, %cst {dimension_numbers = #tpu.dot_dimension_numbers<[1], [0], [0], [1], [0, 0, 1, 1], [], []>} : vector<16x8xf32>, vector<8x256xf32>, vector<16x256xf32> -> vector<16x256xf32>
    %cst_14 = arith.constant dense<0.000000e+00> : vector<16x256xf32>
    %10 = tpu.matmul %1, %8, %cst_14 {dimension_numbers = #tpu.dot_dimension_numbers<[1], [0], [0], [1], [0, 0, 1, 1], [], []>} : vector<16x4xf32>, vector<4x256xf32>, vector<16x256xf32> -> vector<16x256xf32>
    %11 = arith.addf %9, %10 : vector<16x256xf32>
    %12 = vector.broadcast %2 : vector<16x1xf32> to vector<16x256xf32>
    %13 = arith.addf %11, %12 : vector<16x256xf32>
    %cst_15 = arith.constant 0.000000e+00 : f32
    %14 = vector.broadcast %cst_15 : f32 to vector<16x256xf32>
    %15 = arith.maximumf %13, %14 : vector<16x256xf32>
    %16 = vector.broadcast %3 : vector<16x1xf32> to vector<16x256xf32>
    %17 = arith.mulf %15, %16 : vector<16x256xf32>
    %cst_16 = arith.constant dense<0.000000e+00> : vector<256xf32>
    %18 = vector.multi_reduction <add>, %17, %cst_16 [0] : vector<16x256xf32> to vector<256xf32>
    %19 = vector.shape_cast %18 : vector<256xf32> to vector<1x256xf32>
    %20 = vector.broadcast %4 : f32 to vector<1x256xf32>
    %21 = arith.addf %19, %20 : vector<1x256xf32>
    %22 = arith.negf %21 : vector<1x256xf32>
    %23 = math.exp %22 : vector<1x256xf32>
    %cst_17 = arith.constant 1.000000e+00 : f32
    %24 = vector.broadcast %cst_17 : f32 to vector<1x256xf32>
    %25 = arith.addf %24, %23 : vector<1x256xf32>
    %26 = arith.divf %24, %25 : vector<1x256xf32>
    %27 = vector.broadcast %26 : vector<1x256xf32> to vector<4x256xf32>
    %28 = arith.mulf %8, %27 : vector<4x256xf32>
    %c0_18 = arith.constant 0 : index
    %c0_19 = arith.constant 0 : index
    %c0_20 = arith.constant 0 : index
    %29 = vector.load %arg9[%c0_18, %c0_19, %c0_20] : memref<2x4x256xf32, #tpu.memory_space<vmem>>, vector<1x4x256xf32>
    %30 = vector.shape_cast %29 : vector<1x4x256xf32> to vector<4x256xf32>
    %31 = vector.shape_cast %28 : vector<4x256xf32> to vector<1x4x256xf32>
    tpu.vector_store %arg9[%c0_18, %c0_19, %c0_20], %31 {strides = array<i32>} : memref<2x4x256xf32, #tpu.memory_space<vmem>>, vector<1x4x256xf32>,
    %c1 = arith.constant 1 : index
    %c0_21 = arith.constant 0 : index
    %c0_22 = arith.constant 0 : index
    %32 = vector.load %arg2[%c1, %c0_21, %c0_22] : memref<2x8x256xf32, #tpu.memory_space<vmem>>, vector<1x8x256xf32>
    %33 = vector.shape_cast %32 : vector<1x8x256xf32> to vector<8x256xf32>
    %c1_23 = arith.constant 1 : index
    %c0_24 = arith.constant 0 : index
    %c0_25 = arith.constant 0 : index
    %34 = vector.load %arg3[%c1_23, %c0_24, %c0_25] : memref<2x4x256xf32, #tpu.memory_space<vmem>>, vector<1x4x256xf32>
    %35 = vector.shape_cast %34 : vector<1x4x256xf32> to vector<4x256xf32>
    %cst_26 = arith.constant dense<0.000000e+00> : vector<16x256xf32>
    %36 = tpu.matmul %0, %33, %cst_26 {dimension_numbers = #tpu.dot_dimension_numbers<[1], [0], [0], [1], [0, 0, 1, 1], [], []>} : vector<16x8xf32>, vector<8x256xf32>, vector<16x256xf32> -> vector<16x256xf32>
    %cst_27 = arith.constant dense<0.000000e+00> : vector<16x256xf32>
    %37 = tpu.matmul %1, %35, %cst_27 {dimension_numbers = #tpu.dot_dimension_numbers<[1], [0], [0], [1], [0, 0, 1, 1], [], []>} : vector<16x4xf32>, vector<4x256xf32>, vector<16x256xf32> -> vector<16x256xf32>
    %38 = arith.addf %36, %37 : vector<16x256xf32>
    %39 = vector.broadcast %2 : vector<16x1xf32> to vector<16x256xf32>
    %40 = arith.addf %38, %39 : vector<16x256xf32>
    %cst_28 = arith.constant 0.000000e+00 : f32
    %41 = vector.broadcast %cst_28 : f32 to vector<16x256xf32>
    %42 = arith.maximumf %40, %41 : vector<16x256xf32>
    %43 = vector.broadcast %3 : vector<16x1xf32> to vector<16x256xf32>
    %44 = arith.mulf %42, %43 : vector<16x256xf32>
    %cst_29 = arith.constant dense<0.000000e+00> : vector<256xf32>
    %45 = vector.multi_reduction <add>, %44, %cst_29 [0] : vector<16x256xf32> to vector<256xf32>
    %46 = vector.shape_cast %45 : vector<256xf32> to vector<1x256xf32>
    %47 = vector.broadcast %4 : f32 to vector<1x256xf32>
    %48 = arith.addf %46, %47 : vector<1x256xf32>
    %49 = arith.negf %48 : vector<1x256xf32>
    %50 = math.exp %49 : vector<1x256xf32>
    %cst_30 = arith.constant 1.000000e+00 : f32
    %51 = vector.broadcast %cst_30 : f32 to vector<1x256xf32>
    %52 = arith.addf %51, %50 : vector<1x256xf32>
    %53 = arith.divf %51, %52 : vector<1x256xf32>
    %54 = vector.broadcast %53 : vector<1x256xf32> to vector<4x256xf32>
    %55 = arith.mulf %35, %54 : vector<4x256xf32>
    %c1_31 = arith.constant 1 : index
    %c0_32 = arith.constant 0 : index
    %c0_33 = arith.constant 0 : index
    %56 = vector.load %arg9[%c1_31, %c0_32, %c0_33] : memref<2x4x256xf32, #tpu.memory_space<vmem>>, vector<1x4x256xf32>
    %57 = vector.shape_cast %56 : vector<1x4x256xf32> to vector<4x256xf32>
    %58 = vector.shape_cast %55 : vector<4x256xf32> to vector<1x4x256xf32>
    tpu.vector_store %arg9[%c1_31, %c0_32, %c0_33], %58 {strides = array<i32>} : memref<2x4x256xf32, #tpu.memory_space<vmem>>, vector<1x4x256xf32>,
    return
  }
  func.func @transform_0(%arg0: i32, %arg1: i32) -> (i32, i32, i32) {
    %c0_i32 = arith.constant 0 : i32
    %c0_i32_0 = arith.constant 0 : i32
    return %arg0, %c0_i32, %arg1 : i32, i32, i32
  }
  func.func @transform_1(%arg0: i32, %arg1: i32) -> (i32, i32, i32) {
    %c0_i32 = arith.constant 0 : i32
    %c0_i32_0 = arith.constant 0 : i32
    return %arg0, %c0_i32, %arg1 : i32, i32, i32
  }
  func.func @transform_2(%arg0: i32, %arg1: i32) -> (i32, i32) {
    %c0_i32 = arith.constant 0 : i32
    %c0_i32_0 = arith.constant 0 : i32
    %c0_i32_1 = arith.constant 0 : i32
    return %c0_i32, %c0_i32_0 : i32, i32
  }
  func.func @transform_3(%arg0: i32, %arg1: i32) -> (i32, i32) {
    %c0_i32 = arith.constant 0 : i32
    %c0_i32_0 = arith.constant 0 : i32
    %c0_i32_1 = arith.constant 0 : i32
    return %c0_i32, %c0_i32_0 : i32, i32
  }
  func.func @transform_4(%arg0: i32, %arg1: i32) -> (i32, i32) {
    %c0_i32 = arith.constant 0 : i32
    %c0_i32_0 = arith.constant 0 : i32
    %c0_i32_1 = arith.constant 0 : i32
    return %c0_i32, %c0_i32_0 : i32, i32
  }
  func.func @transform_5(%arg0: i32, %arg1: i32) -> (i32, i32) {
    %c0_i32 = arith.constant 0 : i32
    %c0_i32_0 = arith.constant 0 : i32
    %c0_i32_1 = arith.constant 0 : i32
    return %c0_i32, %c0_i32_0 : i32, i32
  }
  func.func @transform_6(%arg0: i32, %arg1: i32) -> i32 {
    %c0_i32 = arith.constant 0 : i32
    %c0_i32_0 = arith.constant 0 : i32
    return %c0_i32 : i32
  }
  func.func @transform_7(%arg0: i32, %arg1: i32) -> (i32, i32, i32) {
    %c0_i32 = arith.constant 0 : i32
    %c0_i32_0 = arith.constant 0 : i32
    return %arg0, %c0_i32, %arg1 : i32, i32, i32
  }
}

</mosaic_0001>

<bundles_post_ra>
// kernel: tpu_custom_call.1
= control target key start
LH: loop header
LB: loop body
LE: loop exit
PB: predicated region body
PF: predicated region fallthrough
CT: control target
= control target key end

     0   :  { %vm102_vm0 = vcmask 64512   ;;  %v521_v8 = vmov 0   ;;  %s655_s0 = inlined_call_operand.vmem [shape: f32[2,8,256], index: 0, kind: input, shape index: {}]   ;;  %s656_s1 = inlined_call_operand.vmem [shape: f32[2,4,256], index: 1, kind: input, shape index: {}]   ;;  %s657_s2 = inlined_call_operand.vmem [shape: f32[16,8], index: 2, kind: input, shape index: {}]   ;;  %s658_s3 = inlined_call_operand.vmem [shape: f32[16,4], index: 3, kind: input, shape index: {}]   ;;  %s659_s4 = inlined_call_operand.vmem [shape: f32[16,1], index: 4, kind: input, shape index: {}]   ;;  %s660_s5 = inlined_call_operand.vmem [shape: f32[16,1], index: 5, kind: input, shape index: {}]   ;;  %s661_s6 = inlined_call_operand.<no memory space> [shape: f32[1], index: 6, kind: input, shape index: {}]   ;;  %s662_s7 = inlined_call_operand.hbm [shape: f32[2,4,256], index: 7, kind: output, shape index: {}]  }
   0x1   :  { %v37_v0 = vld [vmem:[%s655_s0] sm:$0xff]  ;;  %v38_v1 = vld [vmem:[%s655_s0 + $0x8] sm:$0xff]  ;;  %v459_v4 = vld [vmem:[%s655_s0 + $0x18] sm:$0xff]  ;;  %477 = vset.pattern.permute.xlu0 %v521_v8  ;;  %478 = vset.pattern.permute.xlu1 %v521_v8 }
   0x2   :  { %v28_v2 = vld [vmem:[%s657_s2] sm:$0xff]  ;;  %124 = vmatpush.msra.mxu2 %v37_v0  ;;  %147 = vmatpush.msra.mxu3 %v38_v1  ;;  %v458_v5 = vld [vmem:[%s655_s0 + $0x10] sm:$0xff] }
   0x3   :  { %v577_v3 = vld [vmem:[%s656_s1] sm:$0xff]  ;;  %452 = vmatmul.msk.f32.vlgmr.msra.gmra.mxu2 %vm102_vm0, %v28_v2  ;;  %454 = vmatmul.msk.f32.vlgmr.msra.gmra.mxu3 %vm102_vm0, %v28_v2 }
   0x4   :  { %41 = vst [vmem:[#allocation1] ss:$2 sm:$0xff] %v577_v3  ;;  %346 = vmatpush.msrb.mxu3 %v459_v4  ;;  %323 = vmatpush.msrb.mxu2 %v458_v5  ;;  %v32_v6 = vld [vmem:[%s659_s4] sm:$0xff] }
   0x5   :  { %v34_v7 = vld [vmem:[%s660_s5] sm:$0xff] }
   0x6   :  { %13 = vsyncpa [#allocation4], 0  ;;  %157 = vperm.xlu0 %477, %v32_v6   ;;  %175 = vperm.xlu1 %478, %v34_v7   ;;  %vm51_vm1 = vcmask 1043456   ;;  %v597_v9 = vld [vmem:[%s656_s1 + $0x8] sm:$0xff]  ;;  %v30_v10 = vld [vmem:[%s658_s3] sm:$0xff]  ;;  %vm44_vm2 = vcmask 31744  }
   0x7   :  { %v29_v11 = vld [vmem:[%s657_s2 + $0x8] sm:$0xff]  ;;  %s434_s28 = sshll.u32 %s662_s7, 4  ;;  %s523_s29 = smov 128   ;;  %s435_s28 = int_to_ptr.hbm [resolvable:$true] %s434_s28 }
   0x8   :  { %v33_v14 = vld [vmem:[%s659_s4 + $0x8] sm:$0xff]  ;;  %s524_s30 = smov 8  }
   0x9   :  { %v35_v15 = vld [vmem:[%s660_s5 + $0x8] sm:$0xff]  ;;  %s522_s5 = smov [#allocation3]  }
   0xa   :  { %v31_v16 = vld [vmem:[%s658_s3 + $0x8] sm:$0xff] }
   0xb   :  { %v42_v12 = vld.sshfl [vmem:[#allocation1] sm:$0xff pattern:$0x75316420]  ;;  %v43_v13 = vld.sshfl [vmem:[#allocation1 + $0x8] sm:$0xff pattern:$0x75316420]  ;;  %453 = vmatmul.msk.f32.gmra.mxu2 %vm102_vm0, %v29_v11  ;;  %455 = vmatmul.msk.f32.gmra.mxu3 %vm102_vm0, %v29_v11 }
   0xc   :  { %446 = vmatpush.msk.msra.mxu0 %vm51_vm1, %v42_v12  ;;  %449 = vmatpush.msk.msra.mxu1 %vm51_vm1, %v43_v13  ;;  %255 = vst [vmem:[#allocation1] ss:$2 sm:$0xff] %v597_v9 }
   0xd   :  { %447 = vmatmul.msk.f32.vlgmr.msra.gmra.mxu0 %vm44_vm2, %v30_v10  ;;  %450 = vmatmul.msk.f32.vlgmr.msra.gmra.mxu1 %vm44_vm2, %v30_v10 }
   0xe   :  { %162 = vperm.xlu0 %477, %v33_v14   ;;  %180 = vperm.xlu1 %478, %v35_v15   ;;  %v201_v15 = vstv %s661_s6  ;;  %s432_s6 = sshll.u32 %s522_s5, 4  ;;  %s433_s6 = int_to_ptr.vmem [resolvable:$true] %s432_s6 }
  0x13   :  { %v257_v17 = vld.sshfl [vmem:[#allocation1 + $0x8] sm:$0xff pattern:$0x75316420]  ;;  %v256_v18 = vld.sshfl [vmem:[#allocation1] sm:$0xff pattern:$0x75316420]  ;;  %467 = vmatmul.msk.f32.vlgmr.msrb.gmra.mxu2 %vm102_vm0, %v28_v2  ;;  %469 = vmatmul.msk.f32.vlgmr.msrb.gmra.mxu3 %vm102_vm0, %v28_v2 }
  0x14   :  { %464 = vmatpush.msk.msrb.mxu1 %vm51_vm1, %v257_v17  ;;  %461 = vmatpush.msk.msrb.mxu0 %vm51_vm1, %v256_v18 }
  0x15   :  { %448 = vmatmul.msk.f32.gmra.mxu0 %vm44_vm2, %v31_v16  ;;  %451 = vmatmul.msk.f32.gmra.mxu1 %vm44_vm2, %v31_v16 }
  0x1b   :  { %468 = vmatmul.msk.f32.gmra.mxu2 %vm102_vm0, %v29_v11  ;;  %470 = vmatmul.msk.f32.gmra.mxu3 %vm102_vm0, %v29_v11 }
  0x1d   :  { %462 = vmatmul.msk.f32.vlgmr.msrb.gmra.mxu0 %vm44_vm2, %v30_v10  ;;  %465 = vmatmul.msk.f32.vlgmr.msrb.gmra.mxu1 %vm44_vm2, %v30_v10 }
  0x25   :  { %463 = vmatmul.msk.f32.gmra.mxu0 %vm44_vm2, %v31_v16  ;;  %466 = vmatmul.msk.f32.gmra.mxu1 %vm44_vm2, %v31_v16 }
  0x78   :  { %v158_v19 = vpop.permute.xlu0 %157  ;;  %v176_v24 = vpop.permute.xlu1 %175 }
  0x80   :  { %v163_v27 = vpop.permute.xlu0 %162  ;;  %v181_v40 = vpop.permute.xlu1 %180 }
  0x86   :  { %v126_v20 = vpop.f32.mrf.mxu2  ;;  %v149_v21 = vpop.f32.mrf.mxu3 }
  0x8a   :  { %v73_v22 = vpop.f32.mrf.mxu0  ;;  %v96_v23 = vpop.f32.mrf.mxu1 }
  0x8b   :  { %v127_v25 = vadd.f32 %v126_v20, %v73_v22  ;;  %v150_v26 = vadd.f32 %v149_v21, %v96_v23 }
  0x8d   :  { %v165_v28 = vadd.f32 %v158_v19, %v127_v25  ;;  %v166_v29 = vadd.f32 %v158_v19, %v150_v26 }
  0x8e   :  { %v129_v30 = vpop.f32.mrf.mxu2  ;;  %v152_v31 = vpop.f32.mrf.mxu3 }
  0x8f   :  { %v169_v36 = vmax.f32 %v165_v28, 0.0  ;;  %v170_v37 = vmax.f32 %v166_v29, 0.0 }
  0x91   :  { %v183_v43 = vmul.f32 %v176_v24, %v169_v36  ;;  %v184_v44 = vmul.f32 %v176_v24, %v170_v37 }
  0x92   :  { %v76_v32 = vpop.f32.mrf.mxu0  ;;  %v99_v33 = vpop.f32.mrf.mxu1 }
  0x93   :  { %v130_v34 = vadd.f32 %v129_v30, %v76_v32  ;;  %v153_v35 = vadd.f32 %v152_v31, %v99_v33 }
  0x95   :  { %v167_v38 = vadd.f32 %v163_v27, %v130_v34  ;;  %v168_v39 = vadd.f32 %v163_v27, %v153_v35 }
  0x96   :  { %v325_v47 = vpop.f32.mrf.mxu2  ;;  %v348_v48 = vpop.f32.mrf.mxu3 }
  0x97   :  { %v171_v41 = vmax.f32 %v167_v38, 0.0  ;;  %v172_v42 = vmax.f32 %v168_v39, 0.0 }
  0x99   :  { %v185_v45 = vmul.f32 %v181_v40, %v171_v41  ;;  %v186_v46 = vmul.f32 %v181_v40, %v172_v42 }
  0x9a   :  { %v279_v49 = vpop.f32.mrf.mxu0  ;;  %v302_v50 = vpop.f32.mrf.mxu1 }
  0x9b   :  { %v187_v51 = vadd.f32 %v185_v45, %v183_v43  ;;  %v194_v52 = vadd.f32 %v186_v46, %v184_v44  ;;  %v326_v53 = vadd.f32 %v325_v47, %v279_v49  ;;  %v349_v54 = vadd.f32 %v348_v48, %v302_v50 }
  0x9d   :  { %v188_v55 = vrot.slane %v187_v51, 4  ;;  %v195_v56 = vrot.slane %v194_v52, 4  ;;  %v354_v59 = vadd.f32 %v326_v53, %v158_v19  ;;  %v355_v60 = vadd.f32 %v349_v54, %v158_v19 }
  0x9e   :  { %v328_v63 = vpop.f32.mrf.mxu2  ;;  %v351_v0 = vpop.f32.mrf.mxu3 }
  0x9f   :  { %v189_v57 = vadd.f32 %v188_v55, %v187_v51  ;;  %v196_v58 = vadd.f32 %v195_v56, %v194_v52  ;;  %v358_v8 = vmax.f32 %v354_v59, 0.0  ;;  %v359_v10 = vmax.f32 %v355_v60, 0.0 }
  0xa1   :  { %v190_v61 = vrot.slane %v189_v57, 2  ;;  %v197_v62 = vrot.slane %v196_v58, 2  ;;  %v362_v20 = vmul.f32 %v358_v8, %v176_v24  ;;  %v363_v21 = vmul.f32 %v359_v10, %v176_v24 }
  0xa2   :  { %v282_v1 = vpop.f32.mrf.mxu0  ;;  %v305_v2 = vpop.f32.mrf.mxu1 }
  0xa3   :  { %v191_v4 = vadd.f32 %v190_v61, %v189_v57  ;;  %v198_v5 = vadd.f32 %v197_v62, %v196_v58  ;;  %v329_v6 = vadd.f32 %v328_v63, %v282_v1  ;;  %v352_v7 = vadd.f32 %v351_v0, %v305_v2 }
  0xa5   :  { %v192_v11 = vrot.slane %v191_v4, 1  ;;  %v199_v12 = vrot.slane %v198_v5, 1  ;;  %v356_v13 = vadd.f32 %v329_v6, %v163_v27  ;;  %v357_v14 = vadd.f32 %v352_v7, %v163_v27 }
  0xa7   :  { %v193_v16 = vadd.f32 %v192_v11, %v191_v4  ;;  %v200_v17 = vadd.f32 %v199_v12, %v198_v5  ;;  %v360_v18 = vmax.f32 %v356_v13, 0.0  ;;  %v361_v19 = vmax.f32 %v357_v14, 0.0 }
  0xa9   :  { %v202_v22 = vadd.f32 %v201_v15, %v193_v16  ;;  %v203_v23 = vadd.f32 %v201_v15, %v200_v17  ;;  %v364_v25 = vmul.f32 %v360_v18, %v181_v40  ;;  %v365_v26 = vmul.f32 %v361_v19, %v181_v40 }
  0xab   :  { %v456_v28 = vmul.f32 -1.442695, %v202_v22  ;;  %v457_v29 = vmul.f32 -1.442695, %v203_v23  ;;  %v366_v30 = vadd.f32 %v364_v25, %v362_v20  ;;  %v373_v31 = vadd.f32 %v365_v26, %v363_v21 }
  0xad   :  { %479 = vpow2.f32 %v456_v28  ;;  %v367_v27 = vrot.slane %v366_v30, 4  ;;  %v374_v32 = vrot.slane %v373_v31, 4 }
  0xae   :  { %481 = vpow2.f32 %v457_v29 }
  0xaf   :  { %v368_v33 = vadd.f32 %v367_v27, %v366_v30  ;;  %v375_v34 = vadd.f32 %v374_v32, %v373_v31 }
  0xb1   :  { %v369_v35 = vrot.slane %v368_v33, 2  ;;  %v376_v36 = vrot.slane %v375_v34, 2 }
  0xb3   :  { %v480_v37 = vpop.eup %479  ;;  %v370_v38 = vadd.f32 %v369_v35, %v368_v33  ;;  %v377_v39 = vadd.f32 %v376_v36, %v375_v34 }
  0xb4   :  { %v482_v24 = vpop.eup %481  ;;  %v210_v41 = vadd.f32 1.0, %v480_v37 }
  0xb5   :  { %v211_v42 = vadd.f32 1.0, %v482_v24  ;;  %v371_v43 = vrot.slane %v370_v38, 1  ;;  %v378_v40 = vrot.slane %v377_v39, 1 }
  0xb6   :  { %483 = vrcp.f32 %v210_v41  ;;  %vm217_vm5 = vweird.f32 %v210_v41  ;;  %v223_v62 = vand.u32 2147483648, %v210_v41  ;;  %v221_v2 = vand.u32 2147483647, %v210_v41 }
  0xb7   :  { %485 = vrcp.f32 %v211_v42  ;;  %v372_v44 = vadd.f32 %v371_v43, %v370_v38  ;;  %v379_v45 = vadd.f32 %v378_v40, %v377_v39  ;;  %v238_v57 = vand.u32 2147483648, %v211_v42 }
  0xb8   :  { %v236_v59 = vand.u32 2147483647, %v211_v42  ;;  %vm232_vm7 = vweird.f32 %v211_v42  ;;  %v224_v10 = vor.u32 1.1754944e-38, %v223_v62  ;;  %vm222_vm10 = vcmp.eq.f32.partialorder %v221_v2, 8.507059e+37 }
  0xb9   :  { %v380_v46 = vadd.f32 %v372_v44, %v201_v15  ;;  %v381_v47 = vadd.f32 %v379_v45, %v201_v15  ;;  %v239_v6 = vor.u32 1.1754944e-38, %v238_v57 }
  0xba   :  { %vm237_vm9 = vcmp.eq.f32.partialorder %v236_v59, 8.507059e+37 }
  0xbb   :  { %v471_v48 = vmul.f32 -1.442695, %v380_v46  ;;  %v472_v49 = vmul.f32 -1.442695, %v381_v47 }
  0xbc   :  { %v484_v50 = vpop.eup %483 }
  0xbd   :  { %v486_v51 = vpop.eup %485  ;;  %487 = vpow2.f32 %v471_v48  ;;  %v213_v52 = vmul.f32 %v484_v50, %v210_v41  ;;  %vm218_vm3 = vweird.f32 %v484_v50 }
  0xbe   :  { %v228_v53 = vmul.f32 %v486_v51, %v211_v42  ;;  %489 = vpow2.f32 %v472_v49  ;;  %vm233_vm4 = vweird.f32 %v486_v51  ;;  %vm636_vm6 = vmor %vm217_vm5, %vm218_vm3 }
  0xbf   :  { %v214_v54 = vsub.f32 1.0, %v213_v52  ;;  %vm234_vm8 = vmor %vm232_vm7, %vm233_vm4 }
  0xc0   :  { %v229_v55 = vsub.f32 1.0, %v228_v53 }
  0xc1   :  { %v215_v56 = vmul.f32 %v484_v50, %v214_v54 }
  0xc2   :  { %v230_v58 = vmul.f32 %v486_v51, %v229_v55 }
  0xc3   :  { %v488_v60 = vpop.eup %487  ;;  %v216_v61 = vadd.f32 %v484_v50, %v215_v56 }
  0xc4   :  { %v490_v63 = vpop.eup %489  ;;  %v388_v0 = vadd.f32 1.0, %v488_v60  ;;  %v231_v4 = vadd.f32 %v486_v51, %v230_v58 }
  0xc5   :  { %v389_v5 = vadd.f32 1.0, %v490_v63  ;;  %v220_v7 = vsel %vm636_vm6, %v484_v50, %v216_v61 }
  0xc6   :  { %491 = vrcp.f32 %v388_v0  ;;  %v235_v8 = vsel %vm234_vm8, %v486_v51, %v231_v4  ;;  %v225_v13 = vsel %vm222_vm10, %v224_v10, %v220_v7  ;;  %vm395_vm13 = vweird.f32 %v388_v0 }
  0xc7   :  { %493 = vrcp.f32 %v389_v5  ;;  %v240_v11 = vsel %vm237_vm9, %v239_v6, %v235_v8  ;;  %v416_v23 = vand.u32 2147483648, %v389_v5  ;;  %v414_v26 = vand.u32 2147483647, %v389_v5 }
  0xc8   :  { %v244_v12 = vrot.slane %v240_v11, 4  ;;  %v401_v29 = vand.u32 2147483648, %v388_v0  ;;  %vm410_vm15 = vweird.f32 %v389_v5 }
  0xc9   :  { %v417_v27 = vor.u32 1.1754944e-38, %v416_v23  ;;  %vm415_vm2 = vcmp.eq.f32.partialorder %v414_v26, 8.507059e+37 }
  0xca   :  { %v245_v14 = vsel %vm51_vm1, %v225_v13, %v244_v12  ;;  %v402_v34 = vor.u32 1.1754944e-38, %v401_v29 }
  0xcb   :  { %v247_v15 = vmul.f32 %v245_v14, %v577_v3  ;;  %v399_v3 = vand.u32 2147483647, %v388_v0 }
  0xcc   :  { %v492_v16 = vpop.eup %491 }
  0xcd   :  { %v494_v17 = vpop.eup %493  ;;  %248 = vst [vmem:[#allocation3] sm:$0xff] %v247_v15  ;;  %v391_v18 = vmul.f32 %v492_v16, %v388_v0  ;;  %vm396_vm11 = vweird.f32 %v492_v16  ;;  %vm400_vm3 = vcmp.eq.f32.partialorder %v399_v3, 8.507059e+37 }
  0xce   :  { %v406_v19 = vmul.f32 %v494_v17, %v389_v5  ;;  %vm411_vm12 = vweird.f32 %v494_v17  ;;  %vm644_vm14 = vmor %vm395_vm13, %vm396_vm11 }
  0xcf   :  { %v392_v20 = vsub.f32 1.0, %v391_v18  ;;  %vm412_vm0 = vmor %vm410_vm15, %vm411_vm12 }
  0xd0   :  { %v407_v21 = vsub.f32 1.0, %v406_v19 }
  0xd1   :  { %v393_v22 = vmul.f32 %v492_v16, %v392_v20 }
  0xd2   :  { %v408_v25 = vmul.f32 %v494_v17, %v407_v21 }
  0xd3   :  { %v394_v28 = vadd.f32 %v492_v16, %v393_v22 }
  0xd4   :  { %v409_v31 = vadd.f32 %v494_v17, %v408_v25 }
  0xd5   :  { %v398_v32 = vsel %vm644_vm14, %v492_v16, %v394_v28 }
  0xd6   :  { %v413_v33 = vsel %vm412_vm0, %v494_v17, %v409_v31  ;;  %v403_v37 = vsel %vm400_vm3, %v402_v34, %v398_v32 }
  0xd7   :  { %v418_v35 = vsel %vm415_vm2, %v417_v27, %v413_v33 }
  0xd8   :  { %v422_v36 = vrot.slane %v418_v35, 4 }
  0xda   :  { %v423_v38 = vsel %vm51_vm1, %v403_v37, %v422_v36 }
  0xdb   :  { %v425_v39 = vmul.f32 %v597_v9, %v423_v38 }
  0xdd   :  { %427 = vst [vmem:[#allocation3 + $0x8] sm:$0xff] %v425_v39 }
  0xde   :  { %440 = dma.vmem_to_hbm [thread:$0]  %s433_s6, 256, %s435_s28, [#allocation4], %s523_s29, %s523_s29, %s524_s30  }
  0xdf   :  { %519 = dma.done.wait [#allocation4], 256  }
  0xe0   :  { %520 = vsyncadd [#allocation4], 4294967040 }
  0xe1   :  { %445 = vsyncpa [#allocation4], 1 }

</bundles_post_ra>
